<compile_context>
chip_gen: v6e
topology: v6e:2x2x1
jax: 0.10.0
libtpu: 0.0.40
codegen_flags: <defaults>
</compile_context>

<pallas_src>
import functools

import jax
import jax.numpy as jnp
from jax.experimental import pallas as pl
from jax.experimental.pallas import tpu as pltpu


def _swish_kernel(x_ref, o_ref, *, beta):
    x = x_ref[...]
    # f32 compute: matches torch.sigmoid numerics; safe on all TPU generations.
    xf = x.astype(jnp.float32)
    z = xf if beta == 1.0 else xf * jnp.float32(beta)  # skip mul when beta == 1
    o_ref[...] = (xf * jax.nn.sigmoid(z)).astype(o_ref.dtype)


_LANE_CANDIDATES = (4096, 2048, 1024, 512, 384, 256, 128)


def _gen_budgets(itemsize):
    """Generation-aware (target block bytes, vmem_limit cap)."""
    try:
        vmem_cap = int(pltpu.get_tpu_info().vmem_capacity_bytes)
    except Exception:
        vmem_cap = 64 * 1024 * 1024  # assume the smallest (v7x per-TC VMEM)
    if vmem_cap >= 96 * 1024 * 1024:           # v5e / v6e: 128 MiB per TC
        target, cap = 8 * 1024 * 1024, 64 * 1024 * 1024
    else:                                       # v7x (or unknown): 64 MiB per TC
        target, cap = 4 * 1024 * 1024, 32 * 1024 * 1024
    if itemsize < 4:
        # f32 intermediates are (4/itemsize)x the I/O block; shrink the block so
        # the in-kernel footprint stays roughly constant for bf16/f16 inputs.
        target //= 2
    return target, cap


def _choose_layout(n_main, itemsize, target_block_bytes):
    """Pick (lane, rows, tile_rows) for a flat, 128-divisible size-n_main array."""
    sublane_mult = max(8, 32 // itemsize)  # 8 for f32, 16 for bf16/f16

    lane = 128
    for cand in _LANE_CANDIDATES:
        if n_main % cand == 0:
            lane = cand
            break
    rows = n_main // lane
    row_bytes = lane * itemsize
    total_bytes = rows * row_bytes

    if rows <= sublane_mult:
        # Tiny slab: one block equal to the full array dims (always legal).
        return lane, rows, rows

    target_rows = max(sublane_mult, target_block_bytes // row_bytes)
    if total_bytes > (1 << 20):
        # Never emit a single-block grid for >1 MiB tensors: split into >= ~8
        # blocks of >= 256 KiB so the pipeline overlaps and v7x uses both TCs.
        per_block_cap = max(256 * 1024, total_bytes // 8)
        target_rows = min(target_rows, max(sublane_mult, per_block_cap // row_bytes))

    tile_rows = max(sublane_mult, (target_rows // sublane_mult) * sublane_mult)
    if tile_rows >= rows:
        tile_rows = max(sublane_mult, (rows // sublane_mult) * sublane_mult)
    return lane, rows, tile_rows


def swish(x, beta=1.0, *, donate=False):
    """Elementwise Swish: x * sigmoid(beta * x). Accepts any shape."""
    if x.size == 0:
        return x

    orig_shape = x.shape
    dtype = x.dtype
    if not jnp.issubdtype(dtype, jnp.floating):
        raise TypeError(f"swish expects a floating dtype, got {dtype}")

    n = x.size
    itemsize = jnp.dtype(dtype).itemsize
    beta = float(beta)

    def _jnp_swish(v):
        vf = v.astype(jnp.float32)
        zf = vf if beta == 1.0 else vf * jnp.float32(beta)
        return (vf * jax.nn.sigmoid(zf)).astype(dtype)

    x_flat = x.reshape(-1)
    n_main = (n // 128) * 128
    if n_main == 0:
        # Whole tensor is smaller than one 128-lane row: no kernel overhead worth it.
        return _jnp_swish(x_flat).reshape(orig_shape)

    target_block_bytes, vmem_limit_cap = _gen_budgets(itemsize)
    lane, rows, tile_rows = _choose_layout(n_main, itemsize, target_block_bytes)

    x2d = (x_flat if n_main == n else x_flat[:n_main]).reshape(rows, lane)

    grid = (pl.cdiv(rows, tile_rows),)  # ragged last block handled by Pallas
    block_elems = tile_rows * lane
    block_io_bytes = block_elems * itemsize
    # 2x double-buffered input + 2x output blocks, ~4 blocks of f32 intermediates,
    # plus headroom; capped per generation (32 MiB on v7x, 64 MiB on v5e/v6e).
    vmem_limit = int(min(vmem_limit_cap,
                         4 * block_io_bytes + 4 * block_elems * 4 + 8 * 1024 * 1024))

    cost = pl.CostEstimate(
        flops=4 * n_main,
        transcendentals=n_main,
        bytes_accessed=2 * n_main * itemsize,
    )

    kernel = functools.partial(_swish_kernel, beta=beta)
    out2d = pl.pallas_call(
        kernel,
        out_shape=jax.ShapeDtypeStruct((rows, lane), dtype),
        grid_spec=pltpu.PrefetchScalarGridSpec(
            num_scalar_prefetch=0,
            grid=grid,
            in_specs=[pl.BlockSpec((tile_rows, lane), lambda i: (i, 0))],
            out_specs=pl.BlockSpec((tile_rows, lane), lambda i: (i, 0)),
        ),
        compiler_params=pltpu.CompilerParams(
            dimension_semantics=("parallel",),
            vmem_limit_bytes=vmem_limit,
        ),
        cost_estimate=cost,
        input_output_aliases=({0: 0} if donate else {}),
    )(x2d)

    if n_main == n:
        return out2d.reshape(orig_shape)
    # Rare awkward-shape path: tiny (<128-element) tail computed in plain jnp.
    tail = _jnp_swish(x_flat[n_main:])
    return jnp.concatenate([out2d.reshape(-1), tail]).reshape(orig_shape)


if __name__ == "__main__":
    key = jax.random.PRNGKey(0)
    k1, k2, k3, k4 = jax.random.split(key, 4)

    # UNet-style NCHW feature map (the module's typical input).
    x = jax.random.normal(k1, (2, 4, 16, 16), dtype=jnp.float32)
    y = jax.block_until_ready(swish(x, beta=1.0))
    y_ref = x * jax.nn.sigmoid(x)
    assert y.shape == x.shape and y.dtype == x.dtype
    assert jnp.allclose(y, y_ref, atol=1e-6, rtol=1e-6)

    # Non-default beta (trace-time constant, as in the PyTorch module).
    x2 = jax.random.normal(k2, (2, 4, 16, 16), dtype=jnp.float32)
    y2 = jax.block_until_ready(swish(x2, beta=2.0))
    y2_ref = x2 * jax.nn.sigmoid(2.0 * x2)
    assert jnp.allclose(y2, y2_ref, atol=1e-6, rtol=1e-6)

    # Awkward (non-128-divisible) shape exercises the prefix-kernel + jnp-tail path.
    x3 = jax.random.normal(k3, (3, 5, 7, 11), dtype=jnp.float32)
    y3 = jax.block_until_ready(swish(x3))
    y3_ref = x3 * jax.nn.sigmoid(x3)
    assert jnp.allclose(y3, y3_ref, atol=1e-6, rtol=1e-6)

    # Larger feature map exercises the multi-block pipelined grid (grid > 1).
    x4 = jax.random.normal(k4, (2, 64, 64, 64), dtype=jnp.float32)
    y4 = jax.block_until_ready(swish(x4))
    y4_ref = x4 * jax.nn.sigmoid(x4)
    assert jnp.allclose(y4, y4_ref, atol=1e-6, rtol=1e-6)

    print("KERNEL_OK")
</pallas_src>

<mosaic_0001>
module attributes {stable_mosaic.version = 11 : i64} {
  func.func @_swish_kernel(%arg0: i32, %arg1: memref<1x2048xf32, #tpu.memory_space<vmem>>, %arg2: memref<1x2048xf32, #tpu.memory_space<vmem>>) attributes {dimension_semantics = [#tpu.dimension_semantics<parallel>], iteration_bounds = array<i64: 1>, scalar_prefetch = 0 : i64, scratch_operands = 0 : i64, tpu.core_type = #tpu.core_type<tc>, window_params = [{transform_indices = @transform_0, window_bounds = array<i64: 1, 2048>}, {transform_indices = @transform_1, window_bounds = array<i64: 1, 2048>}]} {
    %c0 = arith.constant 0 : index
    %c0_0 = arith.constant 0 : index
    %0 = vector.load %arg1[%c0, %c0_0] : memref<1x2048xf32, #tpu.memory_space<vmem>>, vector<1x2048xf32>
    %1 = arith.negf %0 : vector<1x2048xf32>
    %2 = math.exp %1 : vector<1x2048xf32>
    %cst = arith.constant 1.000000e+00 : f32
    %3 = vector.broadcast %cst : f32 to vector<1x2048xf32>
    %4 = arith.addf %3, %2 : vector<1x2048xf32>
    %5 = arith.divf %3, %4 : vector<1x2048xf32>
    %6 = arith.mulf %0, %5 : vector<1x2048xf32>
    %c0_1 = arith.constant 0 : index
    %c0_2 = arith.constant 0 : index
    %7 = vector.load %arg2[%c0_1, %c0_2] : memref<1x2048xf32, #tpu.memory_space<vmem>>, vector<1x2048xf32>
    tpu.vector_store %arg2[%c0_1, %c0_2], %6 {strides = array<i32>} : memref<1x2048xf32, #tpu.memory_space<vmem>>, vector<1x2048xf32>,
    return
  }
  func.func @transform_0(%arg0: i32) -> (i32, i32) {
    %c0_i32 = arith.constant 0 : i32
    %c0_i32_0 = arith.constant 0 : i32
    return %arg0, %c0_i32 : i32, i32
  }
  func.func @transform_1(%arg0: i32) -> (i32, i32) {
    %c0_i32 = arith.constant 0 : i32
    %c0_i32_0 = arith.constant 0 : i32
    return %arg0, %c0_i32 : i32, i32
  }
}

</mosaic_0001>

<bundles_post_ra>
// kernel: tpu_custom_call.1
= control target key start
LH: loop header
LB: loop body
LE: loop exit
PB: predicated region body
PF: predicated region fallthrough
CT: control target
= control target key end

     0   :  { %6 = vsyncpa [#allocation3], 0  ;;  %s128_s0 = inlined_call_operand.hbm [shape: f32[1,2048], index: 0, kind: input, shape index: {}]   ;;  %s129_s1 = inlined_call_operand.hbm [shape: f32[1,2048], index: 1, kind: output, shape index: {}]  }
   0x1   :  { %7 = vsyncpa [#allocation4], 0  ;;  %s110_s6 = smov [#allocation2]  }
   0x2   :  { %s14_s7 = sshll.u32 %s110_s6, 4  ;;  %s15_s7 = int_to_ptr.vmem [resolvable:$true] %s14_s7 }
   0x3   :  { %s74_s8 = scalar_lea.vmem %s15_s7, 256  ;;  %p79_p1 = scmp.lt.s32.totalorder %s15_s7, %s15_s7 }
   0x4   :  { %p75_p0 = scmp.ne.s32.totalorder %s15_s7, %s74_s8  ;;  %p80_p2 = scmp.lt.s32.totalorder %s74_s8, %s74_s8 }
   0x6   :  { %p81_p3 = por %p80_p2, %p79_p1 }
   0x8   :  { %p82_p4 = pnand %p81_p3, %p75_p0 }
   0xa   :  { %85 = shalt.err (!%p82_p4)
}
   0xb   :  { %17 = dma.hbm_to_vmem [thread:$0]  %s128_s0, 256, %s15_s7, [#allocation3]  }
   0xc   :  { %106 = dma.done.wait [#allocation3], 256  }
   0xd   :  { %107 = vsyncadd [#allocation3], 4294967040  ;;  %v21_v0 = vld [vmem:[#allocation2] sm:$0xff]  ;;  %v22_v1 = vld [vmem:[#allocation2 + $0x8] sm:$0xff]  ;;  %s111_s11 = smov [#allocation5]  }
   0xe   :  { %v54_v2 = vmul.f32 -1.442695, %v21_v0  ;;  %v55_v3 = vmul.f32 -1.442695, %v22_v1  ;;  %s45_s12 = sshll.u32 %s111_s11, 4  ;;  %s46_s12 = int_to_ptr.vmem [resolvable:$true] %s45_s12 }
   0xf   :  { %s86_s0 = scalar_lea.vmem %s46_s12, 256  ;;  %p91_p6 = scmp.lt.s32.totalorder %s46_s12, %s46_s12 }
  0x10   :  { %58 = vpow2.f32 %v54_v2  ;;  %p87_p5 = scmp.ne.s32.totalorder %s46_s12, %s86_s0  ;;  %p92_p7 = scmp.lt.s32.totalorder %s86_s0, %s86_s0 }
  0x11   :  { %60 = vpow2.f32 %v55_v3 }
  0x12   :  { %p93_p8 = por %p92_p7, %p91_p6 }
  0x14   :  { %p94_p9 = pnand %p93_p8, %p87_p5 }
  0x1d   :  { %v59_v4 = vpop.eup %58 }
  0x1e   :  { %v61_v5 = vpop.eup %60  ;;  %v29_v6 = vadd.f32 1.0, %v59_v4 }
  0x1f   :  { %v30_v7 = vadd.f32 1.0, %v61_v5 }
  0x20   :  { %62 = vrcp.f32 %v29_v6 }
  0x21   :  { %64 = vrcp.f32 %v30_v7 }
  0x2d   :  { %v63_v8 = vpop.eup %62 }
  0x2e   :  { %v65_v9 = vpop.eup %64  ;;  %v35_v10 = vmul.f32 %v63_v8, %v21_v0 }
  0x2f   :  { %v36_v11 = vmul.f32 %v65_v9, %v22_v1 }
  0x30   :  { %37 = vst [vmem:[#allocation5] sm:$0xff] %v35_v10 }
  0x31   :  { %38 = vst [vmem:[#allocation5 + $0x8] sm:$0xff] %v36_v11 }
  0x32   :  { %97 = shalt.err (!%p94_p9)
}
  0x33   :  { %48 = dma.vmem_to_hbm [thread:$0]  %s46_s12, 256, %s129_s1, [#allocation4]  }
  0x34   :  { %108 = dma.done.wait [#allocation4], 256  }
  0x35   :  { %109 = vsyncadd [#allocation4], 4294967040 }
  0x36   :  { %52 = vsyncpa [#allocation3], 1 }
  0x37   :  { %53 = vsyncpa [#allocation4], 1 }

</bundles_post_ra>
